<compile_context>
chip_gen: v6e
topology: v6e:2x2x1
jax: 0.10.0
libtpu: 0.0.40
codegen_flags: <defaults>
</compile_context>

<pallas_src>
import jax
import jax.numpy as jnp
from jax.experimental import pallas as pl
from jax.experimental.pallas import tpu as pltpu

LANE = 128          # TPU lane width
MAX_TK = 512        # max K-tile streamed per grid step


def _round_up(x, m):
    return ((x + m - 1) // m) * m


def _pick_tk(kp, max_tk=MAX_TK):
    """Largest multiple-of-128 divisor of kp that is <= max_tk."""
    if kp <= max_tk:
        return kp
    t = max_tk
    while t >= LANE:
        if kp % t == 0:
            return t
        t -= LANE
    return LANE  # kp is a multiple of 128, so 128 always divides


def classifier_kernel(x_ref, w1_ref, b1_ref, w2_ref, b2_ref, o_ref, h_acc):
    """Fused backbone (Linear + ReLU) + fc head.

    grid = (batch_tiles, k_tiles).  k is the contraction axis of the first
    matmul ("arbitrary"); batch tiles are "parallel".
    """
    k = pl.program_id(1)

    @pl.when(k == 0)
    def _():
        h_acc[...] = jnp.zeros_like(h_acc)

    # x arrives f32; cast to bf16 in-kernel (rides a VPU slot) so HBM only
    # sees a single f32 read of x instead of a separate wrapper cast pass.
    xb = x_ref[...].astype(jnp.bfloat16)
    h_acc[...] += jnp.dot(xb, w1_ref[...], preferred_element_type=jnp.float32)

    @pl.when(k == pl.num_programs(1) - 1)
    def _():
        # backbone epilogue in f32 (v5e has no bf16 VPU), then fc head.
        h = jnp.maximum(h_acc[...] + b1_ref[...], 0.0)
        logits = jnp.dot(h.astype(w2_ref.dtype), w2_ref[...],
                         preferred_element_type=jnp.float32)
        o_ref[...] = (logits + b2_ref[...]).astype(o_ref.dtype)  # lane-dense store


def classifier_forward(x_nchw, padded_params, num_classes, *, tm=None, tk=None):
    """x_nchw: [B, C, H, W] float32. Returns logits [B, num_classes] (f32)."""
    w1, b1, w2, b2 = padded_params
    B = x_nchw.shape[0]
    Kp = w1.shape[0]         # padded flattened input dim   (multiple of 128)
    Dp = w1.shape[1]         # padded backbone_output_dim   (multiple of 128)
    Np = w2.shape[1]         # padded num_classes           (multiple of 128)

    # layout plumbing only: flatten, zero-pad K and batch (no dtype cast here).
    x_flat = x_nchw.reshape(B, -1)
    K = x_flat.shape[1]
    if Kp != K:
        x_flat = jnp.pad(x_flat, ((0, 0), (0, Kp - K)))

    if tm is None:
        tm = 128 if B <= 128 else 256      # fill MXU rows; multiple of 16 (bf16 pack)
    Bp = _round_up(max(B, tm), tm)
    if Bp != B:
        x_flat = jnp.pad(x_flat, ((0, Bp - B), (0, 0)))

    if tk is None:
        tk = _pick_tk(Kp)

    grid = (Bp // tm, Kp // tk)

    flops = 2 * Bp * (Kp * Dp + Dp * Np)
    bytes_accessed = (Bp * Kp * 4 + Kp * Dp * 2 + Dp * 4
                      + Dp * Np * 2 + Np * 4 + Bp * Np * 4)

    # VMEM budget: double-buffered streaming tiles, single-buffered residents,
    # plus the accumulator scratch; ~50% headroom, clamped to v7x's 64 MiB.
    vmem_needed = (2 * tm * tk * 4        # x tiles (f32)
                   + 2 * tk * Dp * 2      # w1 tiles (bf16)
                   + 1 * Dp * 4           # b1 (Buffered(1))
                   + 1 * Dp * Np * 2      # w2 (Buffered(1))
                   + 1 * Np * 4           # b2 (Buffered(1))
                   + 2 * tm * Np * 4      # out tiles (f32)
                   + tm * Dp * 4)         # h accumulator scratch
    vmem_limit = int(min(max(vmem_needed * 1.5, 16 * 2**20), 64 * 2**20))

    out = pl.pallas_call(
        classifier_kernel,
        out_shape=jax.ShapeDtypeStruct((Bp, Np), jnp.float32),
        grid_spec=pltpu.PrefetchScalarGridSpec(
            num_scalar_prefetch=0,
            grid=grid,
            in_specs=[
                # x tile per (batch, k) step; f32, cast in-kernel.
                pl.BlockSpec((tm, Kp if tk == Kp else tk), lambda i, k: (i, k)),
                # W1 streamed along k (default double-buffering hides its DMA).
                pl.BlockSpec((tk, Dp), lambda i, k: (k, 0)),
                # Resident operands: constant index_map -> single buffer.
                pl.BlockSpec((1, Dp), lambda i, k: (0, 0),
                             pipeline_mode=pl.Buffered(1)),
                pl.BlockSpec((Dp, Np), lambda i, k: (0, 0),
                             pipeline_mode=pl.Buffered(1)),
                pl.BlockSpec((1, Np), lambda i, k: (0, 0),
                             pipeline_mode=pl.Buffered(1)),
            ],
            out_specs=pl.BlockSpec((tm, Np), lambda i, k: (i, 0)),
            scratch_shapes=[pltpu.VMEM((tm, Dp), jnp.float32)],
        ),
        compiler_params=pltpu.CompilerParams(
            dimension_semantics=("parallel", "arbitrary"),
            vmem_limit_bytes=vmem_limit,
        ),
        cost_estimate=pl.CostEstimate(
            flops=flops, transcendentals=0, bytes_accessed=bytes_accessed),
    )(x_flat, w1, b1, w2, b2)

    # slice padded batch rows and padded class columns back to logical shape.
    return out[:B, :num_classes]


def init_params(key, in_dim, backbone_output_dim, num_classes):
    """Logical (unpadded) f32 parameters, matching nn.Linear shapes but stored
    transposed so the kernel computes x @ W instead of x @ W.T."""
    k1, k2, k3, k4 = jax.random.split(key, 4)
    w1 = jax.random.normal(k1, (in_dim, backbone_output_dim), jnp.float32) * 0.02
    b1 = jax.random.normal(k2, (backbone_output_dim,), jnp.float32) * 0.01
    w2 = jax.random.normal(k3, (backbone_output_dim, num_classes), jnp.float32) * 0.02
    b2 = jax.random.normal(k4, (num_classes,), jnp.float32) * 0.01
    return (w1, b1, w2, b2)


def pad_params(params):
    """Zero-pad K / feature / class dims to multiples of 128; weights -> bf16,
    biases stay f32 for the epilogue."""
    w1, b1, w2, b2 = params
    K, D = w1.shape
    N = w2.shape[1]
    Kp = _round_up(K, LANE)
    Dp = _round_up(D, LANE)
    Np = _round_up(N, LANE)
    w1p = jnp.zeros((Kp, Dp), jnp.bfloat16).at[:K, :D].set(w1.astype(jnp.bfloat16))
    b1p = jnp.zeros((1, Dp), jnp.float32).at[:, :D].set(b1[None, :])
    w2p = jnp.zeros((Dp, Np), jnp.bfloat16).at[:D, :N].set(w2.astype(jnp.bfloat16))
    b2p = jnp.zeros((1, Np), jnp.float32).at[:, :N].set(b2[None, :])
    return (w1p, b1p, w2p, b2p)


if __name__ == "__main__":
    # Small shapes consistent with the module: batch=2, channels=4, spatial 16x16,
    # backbone_output_dim=32, num_classes=10.
    # TODO(synk): the PyTorch `backbone` is an arbitrary injected nn.Module; a
    # synthetic flatten->Linear->ReLU backbone stands in for it here.
    B, C, H, W = 2, 4, 16, 16
    backbone_output_dim = 32
    num_classes = 10
    in_dim = C * H * W  # 1024

    key = jax.random.PRNGKey(0)
    kx, kp = jax.random.split(key)
    x = jax.random.normal(kx, (B, C, H, W), jnp.float32)
    params = init_params(kp, in_dim, backbone_output_dim, num_classes)
    padded_params = pad_params(params)

    logits = classifier_forward(x, padded_params, num_classes)
    logits = jax.block_until_ready(logits)
    assert logits.shape == (B, num_classes)

    # Reference 1: same math (bf16 matmul operands, f32 accumulate) -> tight check.
    w1, b1, w2, b2 = params
    xb = x.reshape(B, -1).astype(jnp.bfloat16)
    h_ref = jnp.maximum(
        jnp.dot(xb, w1.astype(jnp.bfloat16), preferred_element_type=jnp.float32)
        + b1[None, :], 0.0)
    ref_bf16 = jnp.dot(h_ref.astype(jnp.bfloat16), w2.astype(jnp.bfloat16),
                       preferred_element_type=jnp.float32) + b2[None, :]
    assert jnp.allclose(logits, ref_bf16, atol=2e-3, rtol=2e-3)

    # Reference 2: full-f32 forward -> loose sanity check on bf16 quantization.
    ref_f32 = jnp.maximum(x.reshape(B, -1) @ w1 + b1[None, :], 0.0) @ w2 + b2[None, :]
    assert jnp.allclose(logits, ref_f32, atol=5e-2, rtol=5e-2)

    print("KERNEL_OK")
</pallas_src>

<mosaic_0001>
module attributes {stable_mosaic.version = 11 : i64} {
  func.func @classifier_kernel(%arg0: i32, %arg1: i32, %arg2: memref<128x512xf32, #tpu.memory_space<vmem>>, %arg3: memref<512x128xbf16, #tpu.memory_space<vmem>>, %arg4: memref<1x128xf32, #tpu.memory_space<vmem>>, %arg5: memref<128x128xbf16, #tpu.memory_space<vmem>>, %arg6: memref<1x128xf32, #tpu.memory_space<vmem>>, %arg7: memref<128x128xf32, #tpu.memory_space<vmem>>, %arg8: memref<128x128xf32, #tpu.memory_space<vmem>>) attributes {dimension_semantics = [#tpu.dimension_semantics<parallel>, #tpu.dimension_semantics<arbitrary>], iteration_bounds = array<i64: 1, 2>, scalar_prefetch = 0 : i64, scratch_operands = 1 : i64, tpu.core_type = #tpu.core_type<tc>, window_params = [{transform_indices = @transform_0, window_bounds = array<i64: 128, 512>}, {transform_indices = @transform_1, window_bounds = array<i64: 512, 128>}, {pipeline_mode = #tpu.pipeline_mode<synchronous>, transform_indices = @transform_2, window_bounds = array<i64: 1, 128>}, {pipeline_mode = #tpu.pipeline_mode<synchronous>, transform_indices = @transform_3, window_bounds = array<i64: 128, 128>}, {pipeline_mode = #tpu.pipeline_mode<synchronous>, transform_indices = @transform_4, window_bounds = array<i64: 1, 128>}, {transform_indices = @transform_5, window_bounds = array<i64: 128, 128>}]} {
    %c0_i32 = arith.constant 0 : i32
    %0 = arith.cmpi eq, %arg1, %c0_i32 : i32
    %1 = arith.extui %0 : i1 to i32
    %c0_i32_0 = arith.constant 0 : i32
    %2 = arith.cmpi ne, %1, %c0_i32_0 : i32
    scf.if %2 {
      %cst_9 = arith.constant 0.000000e+00 : f32
      %13 = vector.broadcast %cst_9 : f32 to vector<128x128xf32>
      %c0_10 = arith.constant 0 : index
      %c0_11 = arith.constant 0 : index
      %14 = vector.load %arg8[%c0_10, %c0_11] : memref<128x128xf32, #tpu.memory_space<vmem>>, vector<128x128xf32>
      tpu.vector_store %arg8[%c0_10, %c0_11], %13 {strides = array<i32>} : memref<128x128xf32, #tpu.memory_space<vmem>>, vector<128x128xf32>,
    } else {
    }
    %c0 = arith.constant 0 : index
    %c0_1 = arith.constant 0 : index
    %3 = vector.load %arg2[%c0, %c0_1] : memref<128x512xf32, #tpu.memory_space<vmem>>, vector<128x512xf32>
    %4 = arith.truncf %3 : vector<128x512xf32> to vector<128x512xbf16>
    %c0_2 = arith.constant 0 : index
    %c0_3 = arith.constant 0 : index
    %5 = vector.load %arg8[%c0_2, %c0_3] : memref<128x128xf32, #tpu.memory_space<vmem>>, vector<128x128xf32>
    %c0_4 = arith.constant 0 : index
    %c0_5 = arith.constant 0 : index
    %6 = vector.load %arg3[%c0_4, %c0_5] : memref<512x128xbf16, #tpu.memory_space<vmem>>, vector<512x128xbf16>
    %cst = arith.constant dense<0.000000e+00> : vector<128x128xf32>
    %7 = tpu.matmul %4, %6, %cst {dimension_numbers = #tpu.dot_dimension_numbers<[1], [0], [0], [1], [0, 0, 1, 1], [], []>} : vector<128x512xbf16>, vector<512x128xbf16>, vector<128x128xf32> -> vector<128x128xf32>
    %8 = arith.addf %5, %7 : vector<128x128xf32>
    %c0_6 = arith.constant 0 : index
    %c0_7 = arith.constant 0 : index
    %9 = vector.load %arg8[%c0_6, %c0_7] : memref<128x128xf32, #tpu.memory_space<vmem>>, vector<128x128xf32>
    tpu.vector_store %arg8[%c0_6, %c0_7], %8 {strides = array<i32>} : memref<128x128xf32, #tpu.memory_space<vmem>>, vector<128x128xf32>,
    %c1_i32 = arith.constant 1 : i32
    %10 = arith.cmpi eq, %arg1, %c1_i32 : i32
    %11 = arith.extui %10 : i1 to i32
    %c0_i32_8 = arith.constant 0 : i32
    %12 = arith.cmpi ne, %11, %c0_i32_8 : i32
    scf.if %12 {
      %c0_9 = arith.constant 0 : index
      %c0_10 = arith.constant 0 : index
      %13 = vector.load %arg8[%c0_9, %c0_10] : memref<128x128xf32, #tpu.memory_space<vmem>>, vector<128x128xf32>
      %c0_11 = arith.constant 0 : index
      %c0_12 = arith.constant 0 : index
      %14 = vector.load %arg4[%c0_11, %c0_12] : memref<1x128xf32, #tpu.memory_space<vmem>>, vector<1x128xf32>
      %15 = vector.broadcast %14 : vector<1x128xf32> to vector<128x128xf32>
      %16 = arith.addf %13, %15 : vector<128x128xf32>
      %cst_13 = arith.constant 0.000000e+00 : f32
      %17 = vector.broadcast %cst_13 : f32 to vector<128x128xf32>
      %18 = arith.maximumf %16, %17 : vector<128x128xf32>
      %19 = arith.truncf %18 : vector<128x128xf32> to vector<128x128xbf16>
      %c0_14 = arith.constant 0 : index
      %c0_15 = arith.constant 0 : index
      %20 = vector.load %arg5[%c0_14, %c0_15] : memref<128x128xbf16, #tpu.memory_space<vmem>>, vector<128x128xbf16>
      %cst_16 = arith.constant dense<0.000000e+00> : vector<128x128xf32>
      %21 = tpu.matmul %19, %20, %cst_16 {dimension_numbers = #tpu.dot_dimension_numbers<[1], [0], [0], [1], [0, 0, 1, 1], [], []>} : vector<128x128xbf16>, vector<128x128xbf16>, vector<128x128xf32> -> vector<128x128xf32>
      %c0_17 = arith.constant 0 : index
      %c0_18 = arith.constant 0 : index
      %22 = vector.load %arg6[%c0_17, %c0_18] : memref<1x128xf32, #tpu.memory_space<vmem>>, vector<1x128xf32>
      %23 = vector.broadcast %22 : vector<1x128xf32> to vector<128x128xf32>
      %24 = arith.addf %21, %23 : vector<128x128xf32>
      %c0_19 = arith.constant 0 : index
      %c0_20 = arith.constant 0 : index
      %25 = vector.load %arg7[%c0_19, %c0_20] : memref<128x128xf32, #tpu.memory_space<vmem>>, vector<128x128xf32>
      tpu.vector_store %arg7[%c0_19, %c0_20], %24 {strides = array<i32>} : memref<128x128xf32, #tpu.memory_space<vmem>>, vector<128x128xf32>,
    } else {
    }
    return
  }
  func.func @transform_0(%arg0: i32, %arg1: i32) -> (i32, i32) {
    %c0_i32 = arith.constant 0 : i32
    return %arg0, %arg1 : i32, i32
  }
  func.func @transform_1(%arg0: i32, %arg1: i32) -> (i32, i32) {
    %c0_i32 = arith.constant 0 : i32
    %c0_i32_0 = arith.constant 0 : i32
    return %arg1, %c0_i32 : i32, i32
  }
  func.func @transform_2(%arg0: i32, %arg1: i32) -> (i32, i32) {
    %c0_i32 = arith.constant 0 : i32
    %c0_i32_0 = arith.constant 0 : i32
    %c0_i32_1 = arith.constant 0 : i32
    return %c0_i32, %c0_i32_0 : i32, i32
  }
  func.func @transform_3(%arg0: i32, %arg1: i32) -> (i32, i32) {
    %c0_i32 = arith.constant 0 : i32
    %c0_i32_0 = arith.constant 0 : i32
    %c0_i32_1 = arith.constant 0 : i32
    return %c0_i32, %c0_i32_0 : i32, i32
  }
  func.func @transform_4(%arg0: i32, %arg1: i32) -> (i32, i32) {
    %c0_i32 = arith.constant 0 : i32
    %c0_i32_0 = arith.constant 0 : i32
    %c0_i32_1 = arith.constant 0 : i32
    return %c0_i32, %c0_i32_0 : i32, i32
  }
  func.func @transform_5(%arg0: i32, %arg1: i32) -> (i32, i32) {
    %c0_i32 = arith.constant 0 : i32
    %c0_i32_0 = arith.constant 0 : i32
    return %arg0, %c0_i32 : i32, i32
  }
}

</mosaic_0001>

<bundles_post_ra>
// kernel: tpu_custom_call.1
= control target key start
LH: loop header
LB: loop body
LE: loop exit
PB: predicated region body
PF: predicated region fallthrough
CT: control target
= control target key end

     0   :  { %s2163_s0 = inlined_call_operand.hbm [shape: f32[128,1024], index: 0, kind: input, shape index: {}]   ;;  %s2164_s1 = inlined_call_operand.hbm [shape: bf16[1024,128], index: 1, kind: input, shape index: {}]   ;;  %s2165_s2 = inlined_call_operand.vmem [shape: f32[1,128], index: 2, kind: input, shape index: {}]   ;;  %s2166_s3 = inlined_call_operand.hbm [shape: bf16[128,128], index: 3, kind: input, shape index: {}]   ;;  %s2167_s4 = inlined_call_operand.vmem [shape: f32[1,128], index: 4, kind: input, shape index: {}]   ;;  %s2168_s5 = inlined_call_operand.hbm [shape: f32[128,128], index: 5, kind: output, shape index: {}]  }
   0x1   :  { %2175 = sst [smem:[#allocation17_spill]] %s2163_s0 }
   0x2   :  { %2176 = sst [smem:[#allocation18_spill]] %s2166_s3 }
   0x3   :  { %10 = vsyncpa [#allocation4], 0 }
   0x4   :  { %12 = vsyncpa [#allocation4 + $0x1], 0 }
   0x5   :  { %13 = vsyncpa [#allocation7], 0 }
   0x6   :  { %15 = vsyncpa [#allocation7 + $0x1], 0 }
   0x7   :  { %16 = vsyncpa [#allocation5], 0  ;;  %s1879_s18 = smov 0   ;;  %s1881_s19 = smov 0  }
   0x8   :  { %s1883_s20 = smov 0   ;;  %s1885_s21 = smov 0  }
   0x9   :  { %s1887_s22 = smov 0   ;;  %s1889_s23 = smov 0  }
   0xa LB: > { %2177 = sst [smem:[#allocation14_spill]] %s1823_s20  ;;  %s1908_s24 = sadd.s32 4294967295, %s1835_s23   ;;  %s1835_s23 = sphi %s1889_s23, %s22_s23   ;;  %s1831_s22 = sphi %s1887_s22, %s2196_s22   ;;  %s1827_s21 = sphi %s1885_s21, %s2195_s21   ;;  %s1823_s20 = sphi %s1883_s20, %s2191_s20   ;;  %s1819_s19 = sphi %s1881_s19, %s2194_s19   ;;  %s1815_s18 = sphi %s1879_s18, %s2193_s18  }
   0xb   : > { %s43_s25 = sadd.s32 1, %s1823_s20  ;;  %p50_p0 = scmp.ne.s32.totalorder %s1823_s20, %s1819_s19 }
   0xc   : > { %p51_p1 = scmp.eq.s32.totalorder %s1835_s23, 0  ;;  %p56_p2 = scmp.ne.s32.totalorder %s1819_s19, %s1815_s18 }
   0xd   : > { %p57_p3 = scmp.eq.s32.totalorder %s1908_s24, 0  ;;  %p1286_p5 = scmp.ge.s32.totalorder %s1835_s23, 1 }
   0xe   : > { %p52_p4 = por %p51_p1, %p50_p0  ;;  %p182_p7 = scmp.lt.s32.totalorder %s1835_s23, 3 }
   0xf   : > { %p1919_p6 = por %p57_p3, %p56_p2  ;;  %s1837_s28 = smov [#allocation8]  }
  0x10   : > { %p1924_p8 = pnand %p1286_p5, %p182_p7  ;;  %s197_s29 = sshll.u32 %s1837_s28, 4  ;;  %s198_s29 = int_to_ptr.vmem [resolvable:$true] %s197_s29 }
  0x11   : > { %s2178_s26 = scalar_select %p1919_p6, 1, 0 }
  0x12   : > { %s2179_s27 = scalar_select %p1924_p8, 1, 0 }
  0x13   : > { %p1553_p9 = pneg %p1924_p8  ;;  %p1565_p10 = scmp.lt.s32.totalorder %s1835_s23, 2 }
  0x14   : > { %s31_s7 = sadd.s32 1, %s1831_s22  ;;  %s1678_s8 = scalar_lea.vmem %s198_s29, 1024 }
  0x15   : > { %p1933_p11 = pnand %p1553_p9, %p57_p3  ;;  %p1937_p12 = pnand %p1565_p10, %p52_p4 }
  0x16   : > { %p1679_p0 = scmp.ne.s32.totalorder %s198_s29, %s1678_s8  ;;  %p1686_p5 = scmp.lt.s32.totalorder %s198_s29, %s198_s29 }
  0x17   : > { %p1669_p13 = pneg %p1933_p11  ;;  %p1687_p7 = scmp.lt.s32.totalorder %s1678_s8, %s1678_s8 }
  0x19   : > { %p1681_p1 = pnand %p1679_p0, %p1669_p13  ;;  %p1688_p6 = por %p1687_p7, %p1686_p5 }
  0x1b   : > { %p1682_p2 = pneg %p1681_p1 }
  0x1d   : > { %p1689_p8 = pnand %p1688_p6, %p1682_p2 }
  0x1f   : > { %1692 = shalt.err (!%p1689_p8)
}
  0x20   : > { %s2171_s9 = smov 64   ;;  %s2172_s10 = smov 4  }
  0x21   : > { %s2182_s3 = sld [smem:[#allocation18_spill]]  ;;  %p32_p4 = scmp.ge.s32.totalorder %s31_s7, 2 }
  0x22   : > { %s1953_s13 = sand.u32 1, %s1823_s20   ;;  %s1347_s14 = sshll.u32 %s1831_s22, 9 }
  0x23   : > { %s2198_s7 = smov (%p32_p4, %s31_s7), 0  ;;  %s1289_s15 = sshll.u32 %s1953_s13, 9 }
  0x24   : > { %2183 = sst [smem:[#allocation15_spill]] %s2198_s7  ;;  %s39_s16 = ssub.s32 %s1831_s22, %s2198_s7 }
  0x25   : > { %p41_p6 = scmp.eq.s32.totalorder %s39_s16, 0  ;;  %s2184_s0 = sld [smem:[#allocation17_spill]] }
  0x26   : > { %s218_s30 = scalar_lea.vmem [#allocation3], %s1289_s15  ;;  %s238_s11 = sand.u32 1, %s1835_s23  }
  0x27   : > { %1556 = dma.hbm_to_vmem [thread:$0]  (!%p1933_p11), %s2182_s3, 1024, %s198_s29, [#allocation7], %s2171_s9, %s2171_s9, %s2172_s10  }
  0x28   : > { %s228_s8 = sshll.u32 %s218_s30, 4  ;;  %s215_s12 = scalar_lea.sflag [#allocation4], %s1953_s13  ;;  %s229_s8 = int_to_ptr.vmem [resolvable:$true] %s228_s8 }
  0x29   : > { %s1967_s29 = scalar_select %p41_p6, %s1823_s20, %s43_s25  }
  0x2a   : > { %p1695_p8 = pneg %p1937_p12  ;;  %s1706_s9 = scalar_lea.vmem %s229_s8, 8192 }
  0x2b   : > { %s227_s28 = scalar_lea.hbm %s2184_s0, %s1347_s14  ;;  %2185 = sst [smem:[#allocation16_spill]] %s1967_s29 }
  0x2c   : > { %p1707_p9 = scmp.ne.s32.totalorder %s229_s8, %s1706_s9  ;;  %s1840_s16 = smov [#allocation3]  }
  0x2d   : > { %s1711_s10 = sshll.u32 %s1840_s16, 4  ;;  %s1712_s10 = int_to_ptr.vmem [resolvable:$false] %s1711_s10 }
  0x2e   : > { %p1709_p10 = pnand %p1707_p9, %p1695_p8  ;;  %s1713_s14 = scalar_lea.vmem %s1712_s10, 16384 }
  0x2f   : > { %p1714_p13 = scmp.lt.s32.totalorder %s229_s8, %s1712_s10  ;;  %p1715_p0 = scmp.lt.s32.totalorder %s1713_s14, %s1706_s9 }
  0x30   : > { %p1710_p11 = pneg %p1709_p10 }
  0x31   : > { %p1716_p1 = por %p1715_p0, %p1714_p13 }
  0x33   : > { %p1717_p2 = pnand %p1716_p1, %p1710_p11 }
  0x35   : > { %1720 = shalt.err (!%p1717_p2)
}
  0x36   : > { %s1841_s25 = smov 1024   ;;  %s1842_s15 = smov 512  }
  0x37   : > { %s1843_s17 = smov 32   ;;  %s1292_s18 = sshll.u32 %s1953_s13, 8 }
  0x38   : > { %1560 = dma.hbm_to_vmem [thread:$0]  (!%p1937_p12), %s227_s28, 8192, %s229_s8, %s215_s12, %s1841_s25, %s1842_s15, %s1843_s17  }
  0x39   : > { %s1348_s30 = sshll.u32 %s1831_s22, 12  ;;  %s242_s10 = scalar_lea.vmem [#allocation6], %s1292_s18 }
  0x3a   : > { %s248_s3 = scalar_lea.hbm %s2164_s1, %s1348_s30  ;;  %s249_s9 = sshll.u32 %s242_s10, 4  ;;  %s250_s9 = int_to_ptr.vmem [resolvable:$true] %s249_s9 }
  0x3b   : > { %s239_s14 = scalar_lea.sflag [#allocation7], %s238_s11  ;;  %s1734_s7 = scalar_lea.vmem %s250_s9, 4096 }
  0x3c   : > { %p1735_p5 = scmp.ne.s32.totalorder %s250_s9, %s1734_s7  ;;  %s1844_s29 = smov [#allocation6]  }
  0x3d   : > { %s1739_s20 = sshll.u32 %s1844_s29, 4  ;;  %s1740_s20 = int_to_ptr.vmem [resolvable:$false] %s1739_s20 }
  0x3e   : > { %p1737_p7 = pnand %p1735_p5, %p1695_p8  ;;  %s1741_s28 = scalar_lea.vmem %s1740_s20, 8192 }
  0x3f   : > { %p1742_p6 = scmp.lt.s32.totalorder %s250_s9, %s1740_s20  ;;  %p1743_p9 = scmp.lt.s32.totalorder %s1741_s28, %s1734_s7 }
  0x40   : > { %p1738_p4 = pneg %p1737_p7 }
  0x41   : > { %p1744_p10 = por %p1743_p9, %p1742_p6 }
  0x43   : > { %p1745_p11 = pnand %p1744_p10, %p1738_p4 }
  0x45   : > { %1748 = shalt.err (!%p1745_p11)
}
  0x46   : > { %s2186_s0 = smov 4   ;;  %s2187_s13 = smov 64  }
  0x47   : > { %1563 = dma.hbm_to_vmem [thread:$0]  (!%p1937_p12), %s248_s3, 4096, %s250_s9, %s239_s14, %s2187_s13, %s2187_s13, %s2186_s0  }
  0x48   : > { %p2188_p13 = scmp.ne.s32.totalorder %s2179_s27, 0 }
  0x49   : > { %s263_s8 = sand.u32 (!%p2188_p13), 1, %s1819_s19   ;;  %p2189_p8 = scmp.ne.s32.totalorder (!%p2188_p13), %s2178_s26, 0 }
  0x4a   : > { %261 = sbr.rel (%p2188_p13) target bundleno = 657 (0x291), region = 40  ;;  %s1296_s29 = sshll.u32 (!%p2188_p13), %s263_s8, 9 }
  0x4b   : > { %s264_s11 = scalar_lea.sflag (!%p2188_p13), [#allocation4], %s263_s8  ;;  %s1994_s12 = scalar_lea.vmem (!%p2188_p13), [#allocation3], %s1296_s29 }
  0x4f   : > { %1798 = dma.done.wait (%p2189_p8), %s264_s11, 8192  }
  0x50   : > { %1800 = vsyncadd (%p2189_p8), %s264_s11, 4294959104  ;;  %s272_s20 = sand.u32 1, %s1908_s24   ;;  %s1297_s6 = sshll.u32 %s263_s8, 8 }
  0x51   : > { %s273_s3 = scalar_lea.sflag [#allocation7], %s272_s20  ;;  %s2001_s7 = scalar_lea.vmem [#allocation6], %s1297_s6 }
  0x52   : > { %1802 = dma.done.wait (%p2189_p8), %s273_s3, 4096  }
  0x53   : > { %1804 = vsyncadd (%p2189_p8), %s273_s3, 4294963200 }
  0x54   : > { %1806 = dma.done.wait (%p57_p3), [#allocation7], 1024  }
  0x55   : > { %1808 = vsyncadd (%p57_p3), [#allocation7], 4294966272  ;;  %p1299_p12 = scmp.ne.s32.totalorder %s1827_s21, 0 }
  0x57   : > { %315 = sbr.rel (%p1299_p12) target bundleno = 101 (0x65), region = 56 }
  0x5c   : > { %v1845_v0 = vmov 0.0  }
  0x5d   : > { %316 = vst [vmem:[#allocation2 + $0x30] sm:$0xff] %v1845_v0  ;;  %317 = vst [vmem:[#allocation2] sm:$0xff] %v1845_v0 }
  0x5e   : > { %318 = vst [vmem:[#allocation2 + $0x58] sm:$0xff] %v1845_v0  ;;  %319 = vst [vmem:[#allocation2 + $0x18] sm:$0xff] %v1845_v0 }
  0x5f   : > { %320 = vst [vmem:[#allocation2 + $0x50] sm:$0xff] %v1845_v0  ;;  %321 = vst [vmem:[#allocation2 + $0x68] sm:$0xff] %v1845_v0 }
  0x60   : > { %322 = vst [vmem:[#allocation2 + $0x8] sm:$0xff] %v1845_v0  ;;  %323 = vst [vmem:[#allocation2 + $0x48] sm:$0xff] %v1845_v0 }
  0x61   : > { %324 = vst [vmem:[#allocation2 + $0x40] sm:$0xff] %v1845_v0  ;;  %325 = vst [vmem:[#allocation2 + $0x20] sm:$0xff] %v1845_v0 }
  0x62   : > { %326 = vst [vmem:[#allocation2 + $0x10] sm:$0xff] %v1845_v0  ;;  %327 = vst [vmem:[#allocation2 + $0x38] sm:$0xff] %v1845_v0 }
  0x63   : > { %328 = vst [vmem:[#allocation2 + $0x60] sm:$0xff] %v1845_v0  ;;  %329 = vst [vmem:[#allocation2 + $0x70] sm:$0xff] %v1845_v0 }
  0x64   : > { %330 = vst [vmem:[#allocation2 + $0x78] sm:$0xff] %v1845_v0  ;;  %331 = vst [vmem:[#allocation2 + $0x28] sm:$0xff] %v1845_v0 }
  0x65 PF: > { %v1627_v1 = vld [vmem:[%s2001_s7 + $0x78] sm:$0xff]   ;;  %v1631_v5 = vld [vmem:[%s2001_s7 + $0x70] sm:$0xff]   ;;  %v1635_v9 = vld [vmem:[%s2001_s7 + $0x68] sm:$0xff]   ;;  %p1332_p3 = scmp.ne.s32.totalorder %s1827_s21, 1 }
  0x66   : > { %v1628_v2 = vld [vmem:[%s2001_s7 + $0xf8] sm:$0xff]   ;;  %1349 = vmatprep.subr.bf16.mxu0 %v1627_v1  ;;  %v1632_v6 = vld [vmem:[%s2001_s7 + $0xf0] sm:$0xff]   ;;  %v1636_v10 = vld [vmem:[%s2001_s7 + $0xe8] sm:$0xff]  }
  0x67   : > { %v1629_v3 = vld [vmem:[%s2001_s7 + $0x38] sm:$0xff]   ;;  %1413 = vmatprep.subr.bf16.mxu1 %v1628_v2  ;;  %v1633_v7 = vld [vmem:[%s2001_s7 + $0x30] sm:$0xff]   ;;  %v1637_v11 = vld [vmem:[%s2001_s7 + $0x28] sm:$0xff]  }
  0x68   : > { %v1630_v4 = vld [vmem:[%s2001_s7 + $0xb8] sm:$0xff]   ;;  %1350 = vmatpush3.bf16.msra.mxu0 %v1629_v3  ;;  %v1634_v8 = vld [vmem:[%s2001_s7 + $0xb0] sm:$0xff]   ;;  %v1638_v12 = vld [vmem:[%s2001_s7 + $0xa8] sm:$0xff]  }
  0x69   : > { %1414 = vmatpush3.bf16.msra.mxu1 %v1630_v4  ;;  %1351 = vmatprep.subr.bf16.mxu0 %v1631_v5  ;;  %v1639_v13 = vld [vmem:[%s2001_s7 + $0x60] sm:$0xff]   ;;  %v1643_v17 = vld [vmem:[%s2001_s7 + $0x58] sm:$0xff]   ;;  %v1647_v21 = vld [vmem:[%s2001_s7 + $0x50] sm:$0xff]  }
  0x6a   : > { %1415 = vmatprep.subr.bf16.mxu1 %v1632_v6  ;;  %v1640_v14 = vld [vmem:[%s2001_s7 + $0xe0] sm:$0xff]   ;;  %v1644_v18 = vld [vmem:[%s2001_s7 + $0xd8] sm:$0xff]   ;;  %v1648_v22 = vld [vmem:[%s2001_s7 + $0xd0] sm:$0xff]  }
  0x6b   : > { %v1641_v15 = vld [vmem:[%s2001_s7 + $0x20] sm:$0xff]   ;;  %v1645_v19 = vld [vmem:[%s2001_s7 + $0x18] sm:$0xff]   ;;  %v1649_v23 = vld [vmem:[%s2001_s7 + $0x10] sm:$0xff]  }
  0x6c   : > { %1352 = vmatpush3.bf16.msra.mxu0 %v1633_v7  ;;  %v1642_v16 = vld [vmem:[%s2001_s7 + $0xa0] sm:$0xff]   ;;  %v1646_v20 = vld [vmem:[%s2001_s7 + $0x98] sm:$0xff]   ;;  %v1650_v24 = vld [vmem:[%s2001_s7 + $0x90] sm:$0xff]  }
  0x6d   : > { %1416 = vmatpush3.bf16.msra.mxu1 %v1634_v8  ;;  %1353 = vmatprep.subr.bf16.mxu0 %v1635_v9  ;;  %v1651_v25 = vld [vmem:[%s2001_s7 + $0x48] sm:$0xff]   ;;  %v1655_v29 = vld [vmem:[%s2001_s7 + $0x40] sm:$0xff]   ;;  %v335_v35 = vld [vmem:[%s1994_s12 + $0x18] sm:$0xff] }
  0x6e   : > { %1417 = vmatprep.subr.bf16.mxu1 %v1636_v10  ;;  %v1652_v26 = vld [vmem:[%s2001_s7 + $0xc8] sm:$0xff]   ;;  %v1656_v30 = vld [vmem:[%s2001_s7 + $0xc0] sm:$0xff]   ;;  %v339_v37 = vld [vmem:[%s1994_s12 + $0x38] sm:$0xff] }
  0x6f   : > { %v1653_v27 = vld [vmem:[%s2001_s7 + $0x8] sm:$0xff]   ;;  %v1657_v31 = vld [vmem:[%s2001_s7] sm:$0xff]   ;;  %v399_v40 = vpack.c.bf16 %v339_v37, %v335_v35  ;;  %v334_v42 = vld [vmem:[%s1994_s12 + $0x10] sm:$0xff] }
  0x70   : > { %1354 = vmatpush3.bf16.msra.mxu0 %v1637_v11  ;;  %v1654_v28 = vld [vmem:[%s2001_s7 + $0x88] sm:$0xff]   ;;  %v1658_v32 = vld [vmem:[%s2001_s7 + $0x80] sm:$0xff]   ;;  %v338_v43 = vld [vmem:[%s1994_s12 + $0x30] sm:$0xff] }
  0x71   : > { %1418 = vmatpush3.bf16.msra.mxu1 %v1638_v12  ;;  %1355 = vmatprep.subr.bf16.mxu0 %v1639_v13  ;;  %v333_v33 = vld [vmem:[%s1994_s12 + $0x8] sm:$0xff]  ;;  %v332_v38 = vld [vmem:[%s1994_s12] sm:$0xff]  ;;  %v398_v45 = vpack.c.bf16 %v338_v43, %v334_v42  ;;  %v343_v47 = vld [vmem:[%s1994_s12 + $0x58] sm:$0xff] }
  0x72   : > { %1419 = vmatprep.subr.bf16.mxu1 %v1640_v14  ;;  %v337_v34 = vld [vmem:[%s1994_s12 + $0x28] sm:$0xff]  ;;  %v336_v39 = vld [vmem:[%s1994_s12 + $0x20] sm:$0xff]  ;;  %v347_v48 = vld [vmem:[%s1994_s12 + $0x78] sm:$0xff]  ;;  %829 = vmatprep.mubr.bf16.mxu1 %v399_v40 }
  0x73   : > { %v397_v36 = vpack.c.bf16 %v337_v34, %v333_v33  ;;  %v396_v41 = vpack.c.bf16 %v336_v39, %v332_v38  ;;  %v341_v44 = vld [vmem:[%s1994_s12 + $0x48] sm:$0xff]  ;;  %v403_v50 = vpack.c.bf16 %v347_v48, %v343_v47  ;;  %v340_v51 = vld [vmem:[%s1994_s12 + $0x40] sm:$0xff]  ;;  %v342_v53 = vld [vmem:[%s1994_s12 + $0x50] sm:$0xff] }
  0x74   : > { %1356 = vmatpush3.bf16.msra.mxu0 %v1641_v15  ;;  %v345_v46 = vld [vmem:[%s1994_s12 + $0x68] sm:$0xff]  ;;  %v344_v52 = vld [vmem:[%s1994_s12 + $0x60] sm:$0xff]  ;;  %v346_v54 = vld [vmem:[%s1994_s12 + $0x70] sm:$0xff] }
  0x75   : > { %1420 = vmatpush3.bf16.msra.mxu1 %v1642_v16  ;;  %1357 = vmatprep.subr.bf16.mxu0 %v1643_v17  ;;  %v401_v49 = vpack.c.bf16 %v345_v46, %v341_v44  ;;  %v349_v55 = vld [vmem:[%s1994_s12 + $0x88] sm:$0xff]  ;;  %v351_v57 = vld [vmem:[%s1994_s12 + $0x98] sm:$0xff]  ;;  %v400_v59 = vpack.c.bf16 %v344_v52, %v340_v51  ;;  %v402_v60 = vpack.c.bf16 %v346_v54, %v342_v53  ;;  %v348_v63 = vld [vmem:[%s1994_s12 + $0x80] sm:$0xff] }
  0x76   : > { %1421 = vmatprep.subr.bf16.mxu1 %v1644_v18  ;;  %732 = vmatprep.mubr.bf16.mxu0 %v397_v36  ;;  %v353_v56 = vld [vmem:[%s1994_s12 + $0xa8] sm:$0xff]  ;;  %v355_v58 = vld [vmem:[%s1994_s12 + $0xb8] sm:$0xff]  ;;  %v352_v0 = vld [vmem:[%s1994_s12 + $0xa0] sm:$0xff] }
  0x77   : > { %v405_v61 = vpack.c.bf16 %v353_v56, %v349_v55  ;;  %v407_v62 = vpack.c.bf16 %v355_v58, %v351_v57  ;;  %v350_v1 = vld [vmem:[%s1994_s12 + $0x90] sm:$0xff]  ;;  %v357_v3 = vld [vmem:[%s1994_s12 + $0xc8] sm:$0xff]  ;;  %v359_v5 = vld [vmem:[%s1994_s12 + $0xd8] sm:$0xff]  ;;  %v404_v7 = vpack.c.bf16 %v352_v0, %v348_v63 }
  0x78   : > { %1358 = vmatpush3.bf16.msra.mxu0 %v1645_v19  ;;  %v354_v2 = vld [vmem:[%s1994_s12 + $0xb0] sm:$0xff]  ;;  %v361_v4 = vld [vmem:[%s1994_s12 + $0xe8] sm:$0xff]  ;;  %v363_v6 = vld [vmem:[%s1994_s12 + $0xf8] sm:$0xff] }
  0x79   : > { %1422 = vmatpush3.bf16.msra.mxu1 %v1646_v20  ;;  %1359 = vmatprep.subr.bf16.mxu0 %v1647_v21  ;;  %v406_v8 = vpack.c.bf16 %v354_v2, %v350_v1  ;;  %v409_v9 = vpack.c.bf16 %v361_v4, %v357_v3  ;;  %v411_v10 = vpack.c.bf16 %v363_v6, %v359_v5  ;;  %v356_v11 = vld [vmem:[%s1994_s12 + $0xc0] sm:$0xff]  ;;  %v358_v13 = vld [vmem:[%s1994_s12 + $0xd0] sm:$0xff]  ;;  %v365_v15 = vld [vmem:[%s1994_s12 + $0x108] sm:$0xff] }
  0x7a   : > { %1423 = vmatprep.subr.bf16.mxu1 %v1648_v22  ;;  %v360_v12 = vld [vmem:[%s1994_s12 + $0xe0] sm:$0xff]  ;;  %v362_v14 = vld [vmem:[%s1994_s12 + $0xf0] sm:$0xff]  ;;  %v369_v16 = vld [vmem:[%s1994_s12 + $0x128] sm:$0xff] }
  0x7b   : > { %v367_v17 = vld [vmem:[%s1994_s12 + $0x118] sm:$0xff]  ;;  %v408_v19 = vpack.c.bf16 %v360_v12, %v356_v11  ;;  %v410_v20 = vpack.c.bf16 %v362_v14, %v358_v13  ;;  %v413_v21 = vpack.c.bf16 %v369_v16, %v365_v15  ;;  %v372_v35 = vld [vmem:[%s1994_s12 + $0x140] sm:$0xff]  ;;  %v374_v37 = vld [vmem:[%s1994_s12 + $0x150] sm:$0xff] }
  0x7c   : > { %1360 = vmatpush3.bf16.msra.mxu0 %v1649_v23  ;;  %v371_v18 = vld [vmem:[%s1994_s12 + $0x138] sm:$0xff]  ;;  %v364_v23 = vld [vmem:[%s1994_s12 + $0x100] sm:$0xff]  ;;  %v378_v38 = vld [vmem:[%s1994_s12 + $0x170] sm:$0xff] }
  0x7d   : > { %1424 = vmatpush3.bf16.msra.mxu1 %v1650_v24  ;;  %1361 = vmatprep.subr.bf16.mxu0 %v1651_v25  ;;  %v415_v22 = vpack.c.bf16 %v371_v18, %v367_v17  ;;  %v368_v24 = vld [vmem:[%s1994_s12 + $0x120] sm:$0xff]  ;;  %v366_v25 = vld [vmem:[%s1994_s12 + $0x110] sm:$0xff]  ;;  %v381_v39 = vld [vmem:[%s1994_s12 + $0x188] sm:$0xff]  ;;  %v418_v44 = vpack.c.bf16 %v378_v38, %v374_v37 }
  0x7e   : > { %1425 = vmatprep.subr.bf16.mxu1 %v1652_v26  ;;  %v370_v26 = vld [vmem:[%s1994_s12 + $0x130] sm:$0xff]  ;;  %v376_v36 = vld [vmem:[%s1994_s12 + $0x160] sm:$0xff]  ;;  %v385_v40 = vld [vmem:[%s1994_s12 + $0x1a8] sm:$0xff] }
  0x7f   : > { %v387_v42 = vld [vmem:[%s1994_s12 + $0x1b8] sm:$0xff]  ;;  %v416_v43 = vpack.c.bf16 %v376_v36, %v372_v35  ;;  %v380_v47 = vld [vmem:[%s1994_s12 + $0x180] sm:$0xff]  ;;  %v389_v51 = vld [vmem:[%s1994_s12 + $0x1c8] sm:$0xff] }
  0x80   : > { %1362 = vmatpush3.bf16.msra.mxu0 %v1653_v27  ;;  %v373_v27 = vld [vmem:[%s1994_s12 + $0x148] sm:$0xff]  ;;  %v384_v48 = vld [vmem:[%s1994_s12 + $0x1a0] sm:$0xff]  ;;  %v391_v53 = vld [vmem:[%s1994_s12 + $0x1d8] sm:$0xff] }
  0x81   : > { %1426 = vmatpush3.bf16.msra.mxu1 %v1654_v28  ;;  %1363 = vmatprep.subr.bf16.mxu0 %v1655_v29  ;;  %v377_v28 = vld [vmem:[%s1994_s12 + $0x168] sm:$0xff]  ;;  %v375_v29 = vld [vmem:[%s1994_s12 + $0x158] sm:$0xff]  ;;  %v420_v55 = vpack.c.bf16 %v384_v48, %v380_v47  ;;  %v429_v17 = vld [vmem:[#allocation2] sm:$0xff] }
  0x82   : > { %1427 = vmatprep.subr.bf16.mxu1 %v1656_v30  ;;  %v379_v30 = vld [vmem:[%s1994_s12 + $0x178] sm:$0xff]  ;;  %v417_v33 = vpack.c.bf16 %v377_v28, %v373_v27  ;;  %v393_v52 = vld [vmem:[%s1994_s12 + $0x1e8] sm:$0xff] }
  0x83   : > { %v419_v34 = vpack.c.bf16 %v379_v30, %v375_v29  ;;  %v395_v54 = vld [vmem:[%s1994_s12 + $0x1f8] sm:$0xff]  ;;  %v425_v57 = vpack.c.bf16 %v393_v52, %v389_v51 }
  0x84   : > { %1364 = vmatpush3.bf16.msra.mxu0 %v1657_v31  ;;  %v412_v31 = vpack.c.bf16 %v368_v24, %v364_v23  ;;  %v427_v58 = vpack.c.bf16 %v395_v54, %v391_v53  ;;  %v431_v35 = vld [vmem:[#allocation2 + $0x18] sm:$0xff]  ;;  %v433_v53 = vld [vmem:[#allocation2 + $0x68] sm:$0xff] }
  0x85   : > { %1428 = vmatpush3.bf16.msra.mxu1 %v1658_v32  ;;  %v414_v32 = vpack.c.bf16 %v370_v26, %v366_v25  ;;  %v430_v26 = vld [vmem:[#allocation2 + $0x58] sm:$0xff] }
  0x87   : > { %733 = vmatmul.mubr.bf16.vlgmr.msra.gmra.mxu0 %v396_v41  ;;  %v383_v41 = vld [vmem:[%s1994_s12 + $0x198] sm:$0xff] }
  0x88   : > { %830 = vmatmul.mubr.bf16.vlgmr.msra.gmra.mxu1 %v398_v45  ;;  %740 = vmatprep.mubr.bf16.mxu0 %v401_v49  ;;  %v421_v45 = vpack.c.bf16 %v385_v40, %v381_v39  ;;  %v423_v46 = vpack.c.bf16 %v387_v42, %v383_v41  ;;  %v382_v49 = vld [vmem:[%s1994_s12 + $0x190] sm:$0xff] }
  0x89   : > { %837 = vmatprep.mubr.bf16.mxu1 %v403_v50  ;;  %v386_v50 = vld [vmem:[%s1994_s12 + $0x1b0] sm:$0xff] }
  0x8a   : > { %v422_v56 = vpack.c.bf16 %v386_v50, %v382_v49 }
  0x8f   : > { %741 = vmatmul.mubr.bf16.gmra.mxu0 %v400_v59  ;;  %v388_v59 = vld [vmem:[%s1994_s12 + $0x1c0] sm:$0xff] }
  0x90   : > { %838 = vmatmul.mubr.bf16.gmra.mxu1 %v402_v60  ;;  %748 = vmatprep.mubr.bf16.mxu0 %v405_v61  ;;  %v392_v60 = vld [vmem:[%s1994_s12 + $0x1e0] sm:$0xff]  ;;  %v390_v61 = vld [vmem:[%s1994_s12 + $0x1d0] sm:$0xff] }
  0x91   : > { %845 = vmatprep.mubr.bf16.mxu1 %v407_v62  ;;  %v394_v62 = vld [vmem:[%s1994_s12 + $0x1f0] sm:$0xff]  ;;  %v424_v63 = vpack.c.bf16 %v392_v60, %v388_v59 }
  0x92   : > { %v426_v0 = vpack.c.bf16 %v394_v62, %v390_v61  ;;  %v434_v62 = vld [vmem:[#allocation2 + $0x8] sm:$0xff] }
  0x97   : > { %749 = vmatmul.mubr.bf16.gmra.mxu0 %v404_v7 }
  0x98   : > { %846 = vmatmul.mubr.bf16.gmra.mxu1 %v406_v8  ;;  %756 = vmatprep.mubr.bf16.mxu0 %v409_v9  ;;  %v428_v8 = vld [vmem:[#allocation2 + $0x30] sm:$0xff] }
  0x99   : > { %853 = vmatprep.mubr.bf16.mxu1 %v411_v10 }
  0x9f   : > { %757 = vmatmul.mubr.bf16.gmra.mxu0 %v408_v19 }
  0xa0   : > { %854 = vmatmul.mubr.bf16.gmra.mxu1 %v410_v20  ;;  %764 = vmatprep.mubr.bf16.mxu0 %v413_v21 }
  0xa1   : > { %861 = vmatprep.mubr.bf16.mxu1 %v415_v22 }
  0xa7   : > { %765 = vmatmul.mubr.bf16.gmra.mxu0 %v412_v31 }
  0xa8   : > { %862 = vmatmul.mubr.bf16.gmra.mxu1 %v414_v32  ;;  %772 = vmatprep.mubr.bf16.mxu0 %v417_v33 }
  0xa9   : > { %869 = vmatprep.mubr.bf16.mxu1 %v419_v34 }
  0xaf   : > { %773 = vmatmul.mubr.bf16.gmra.mxu0 %v416_v43 }
  0xb0   : > { %870 = vmatmul.mubr.bf16.gmra.mxu1 %v418_v44  ;;  %780 = vmatprep.mubr.bf16.mxu0 %v421_v45  ;;  %v432_v44 = vld [vmem:[#allocation2 + $0x50] sm:$0xff] }
  0xb1   : > { %877 = vmatprep.mubr.bf16.mxu1 %v423_v46 }
  0xb7   : > { %781 = vmatmul.mubr.bf16.gmra.mxu0 %v420_v55 }
  0xb8   : > { %878 = vmatmul.mubr.bf16.gmra.mxu1 %v422_v56  ;;  %788 = vmatprep.mubr.bf16.mxu0 %v425_v57 }
  0xb9   : > { %885 = vmatprep.mubr.bf16.mxu1 %v427_v58 }
  0xbf   : > { %789 = vmatmul.mubr.bf16.gmra.mxu0 %v424_v63 }
  0xc0   : > { %886 = vmatmul.mubr.bf16.gmra.mxu1 %v426_v0 }
 0x147   : > { %v1365_v1 = vpop.f32.mrf.mxu0 }
 0x148   : > { %v1429_v2 = vpop.f32.mrf.mxu1 }
 0x149   : > { %v1366_v3 = vpop.f32.mrf.mxu0 }
 0x14a   : > { %v1367_v4 = vadd.f32 %v1366_v3, %v1365_v1  ;;  %v1430_v5 = vpop.f32.mrf.mxu1 }
 0x14b   : > { %v1431_v6 = vadd.f32 %v1430_v5, %v1429_v2  ;;  %v1368_v7 = vpop.f32.mrf.mxu0 }
 0x14c   : > { %v1432_v9 = vpop.f32.mrf.mxu1 }
 0x14d   : > { %v832_v10 = vadd.f32 %v1431_v6, %v1367_v4  ;;  %v1369_v11 = vpop.f32.mrf.mxu0 }
 0x14e   : > { %v1370_v12 = vadd.f32 %v1369_v11, %v1368_v7  ;;  %v1433_v13 = vpop.f32.mrf.mxu1  ;;  %v435_v7 = vld [vmem:[#allocation2 + $0x48] sm:$0xff] }
 0x14f   : > { %v894_v14 = vadd.f32 %v832_v10, %v428_v8  ;;  %v1434_v15 = vadd.f32 %v1433_v13, %v1432_v9  ;;  %v1371_v16 = vpop.f32.mrf.mxu0 }
 0x150   : > { %v1435_v18 = vpop.f32.mrf.mxu1 }
 0x151   : > { %910 = vst [vmem:[#allocation2 + $0x30] sm:$0xff] %v894_v14  ;;  %v835_v19 = vadd.f32 %v1434_v15, %v1370_v12  ;;  %v1372_v20 = vpop.f32.mrf.mxu0 }
 0x152   : > { %v1373_v21 = vadd.f32 %v1372_v20, %v1371_v16  ;;  %v1436_v22 = vpop.f32.mrf.mxu1  ;;  %v436_v16 = vld [vmem:[#allocation2 + $0x40] sm:$0xff] }
 0x153   : > { %v895_v23 = vadd.f32 %v835_v19, %v429_v17  ;;  %v1437_v24 = vadd.f32 %v1436_v22, %v1435_v18  ;;  %v1374_v25 = vpop.f32.mrf.mxu0 }
 0x154   : > { %v1438_v27 = vpop.f32.mrf.mxu1 }
 0x155   : > { %911 = vst [vmem:[#allocation2] sm:$0xff] %v895_v23  ;;  %v840_v28 = vadd.f32 %v1437_v24, %v1373_v21  ;;  %v1375_v29 = vpop.f32.mrf.mxu0 }
 0x156   : > { %v1376_v30 = vadd.f32 %v1375_v29, %v1374_v25  ;;  %v1439_v31 = vpop.f32.mrf.mxu1  ;;  %v437_v25 = vld [vmem:[#allocation2 + $0x20] sm:$0xff] }
 0x157   : > { %v896_v32 = vadd.f32 %v840_v28, %v430_v26  ;;  %v1440_v33 = vadd.f32 %v1439_v31, %v1438_v27  ;;  %v1377_v34 = vpop.f32.mrf.mxu0 }
 0x158   : > { %v1441_v36 = vpop.f32.mrf.mxu1 }
 0x159   : > { %912 = vst [vmem:[#allocation2 + $0x58] sm:$0xff] %v896_v32  ;;  %v843_v37 = vadd.f32 %v1440_v33, %v1376_v30  ;;  %v1378_v38 = vpop.f32.mrf.mxu0 }
 0x15a   : > { %v1379_v39 = vadd.f32 %v1378_v38, %v1377_v34  ;;  %v1442_v40 = vpop.f32.mrf.mxu1  ;;  %v438_v34 = vld [vmem:[#allocation2 + $0x10] sm:$0xff] }
 0x15b   : > { %v897_v41 = vadd.f32 %v843_v37, %v431_v35  ;;  %v1443_v42 = vadd.f32 %v1442_v40, %v1441_v36  ;;  %v1380_v43 = vpop.f32.mrf.mxu0 }
 0x15c   : > { %v1444_v45 = vpop.f32.mrf.mxu1 }
 0x15d   : > { %913 = vst [vmem:[#allocation2 + $0x18] sm:$0xff] %v897_v41  ;;  %v848_v46 = vadd.f32 %v1443_v42, %v1379_v39  ;;  %v1381_v47 = vpop.f32.mrf.mxu0 }
 0x15e   : > { %v1382_v48 = vadd.f32 %v1381_v47, %v1380_v43  ;;  %v1445_v49 = vpop.f32.mrf.mxu1  ;;  %v439_v43 = vld [vmem:[#allocation2 + $0x38] sm:$0xff] }
 0x15f   : > { %v898_v50 = vadd.f32 %v848_v46, %v432_v44  ;;  %v1446_v51 = vadd.f32 %v1445_v49, %v1444_v45  ;;  %v1383_v52 = vpop.f32.mrf.mxu0 }
 0x160   : > { %v1447_v54 = vpop.f32.mrf.mxu1 }
 0x161   : > { %914 = vst [vmem:[#allocation2 + $0x50] sm:$0xff] %v898_v50  ;;  %v851_v55 = vadd.f32 %v1446_v51, %v1382_v48  ;;  %v1384_v56 = vpop.f32.mrf.mxu0 }
 0x162   : > { %v1385_v57 = vadd.f32 %v1384_v56, %v1383_v52  ;;  %v1448_v58 = vpop.f32.mrf.mxu1  ;;  %v440_v52 = vld [vmem:[#allocation2 + $0x60] sm:$0xff] }
 0x163   : > { %v899_v59 = vadd.f32 %v851_v55, %v433_v53  ;;  %v1449_v60 = vadd.f32 %v1448_v58, %v1447_v54  ;;  %v1386_v61 = vpop.f32.mrf.mxu0 }
 0x164   : > { %v1450_v63 = vpop.f32.mrf.mxu1 }
 0x165   : > { %915 = vst [vmem:[#allocation2 + $0x68] sm:$0xff] %v899_v59  ;;  %v856_v0 = vadd.f32 %v1449_v60, %v1385_v57  ;;  %v1387_v1 = vpop.f32.mrf.mxu0 }
 0x166   : > { %v1388_v2 = vadd.f32 %v1387_v1, %v1386_v61  ;;  %v1451_v3 = vpop.f32.mrf.mxu1  ;;  %v441_v61 = vld [vmem:[#allocation2 + $0x70] sm:$0xff] }
 0x167   : > { %v900_v4 = vadd.f32 %v856_v0, %v434_v62  ;;  %v1452_v5 = vadd.f32 %v1451_v3, %v1450_v63  ;;  %v1389_v6 = vpop.f32.mrf.mxu0 }
 0x168   : > { %v1453_v8 = vpop.f32.mrf.mxu1 }
 0x169   : > { %916 = vst [vmem:[#allocation2 + $0x8] sm:$0xff] %v900_v4  ;;  %v859_v9 = vadd.f32 %v1452_v5, %v1388_v2  ;;  %v1390_v10 = vpop.f32.mrf.mxu0 }
 0x16a   : > { %v1391_v11 = vadd.f32 %v1390_v10, %v1389_v6  ;;  %v1454_v12 = vpop.f32.mrf.mxu1  ;;  %v442_v6 = vld [vmem:[#allocation2 + $0x78] sm:$0xff] }
 0x16b   : > { %v901_v13 = vadd.f32 %v859_v9, %v435_v7  ;;  %v1455_v14 = vadd.f32 %v1454_v12, %v1453_v8  ;;  %v1392_v15 = vpop.f32.mrf.mxu0 }
 0x16c   : > { %v1456_v17 = vpop.f32.mrf.mxu1 }
 0x16d   : > { %917 = vst [vmem:[#allocation2 + $0x48] sm:$0xff] %v901_v13  ;;  %v864_v18 = vadd.f32 %v1455_v14, %v1391_v11  ;;  %v1393_v19 = vpop.f32.mrf.mxu0  ;;  %v443_v14 = vld [vmem:[#allocation2 + $0x28] sm:$0xff] }
 0x16e   : > { %v1394_v20 = vadd.f32 %v1393_v19, %v1392_v15  ;;  %v1457_v21 = vpop.f32.mrf.mxu1 }
 0x16f   : > { %v902_v22 = vadd.f32 %v864_v18, %v436_v16  ;;  %v1458_v23 = vadd.f32 %v1457_v21, %v1456_v17  ;;  %v1395_v24 = vpop.f32.mrf.mxu0 }
 0x170   : > { %v1459_v26 = vpop.f32.mrf.mxu1 }
 0x171   : > { %918 = vst [vmem:[#allocation2 + $0x40] sm:$0xff] %v902_v22  ;;  %v867_v27 = vadd.f32 %v1458_v23, %v1394_v20  ;;  %v1396_v28 = vpop.f32.mrf.mxu0 }
 0x172   : > { %v1397_v29 = vadd.f32 %v1396_v28, %v1395_v24  ;;  %v1460_v30 = vpop.f32.mrf.mxu1 }
 0x173   : > { %v903_v31 = vadd.f32 %v867_v27, %v437_v25  ;;  %v1461_v32 = vadd.f32 %v1460_v30, %v1459_v26  ;;  %v1398_v33 = vpop.f32.mrf.mxu0 }
 0x174   : > { %v1462_v35 = vpop.f32.mrf.mxu1 }
 0x175   : > { %919 = vst [vmem:[#allocation2 + $0x20] sm:$0xff] %v903_v31  ;;  %v872_v36 = vadd.f32 %v1461_v32, %v1397_v29  ;;  %v1399_v37 = vpop.f32.mrf.mxu0 }
 0x176   : > { %v1400_v38 = vadd.f32 %v1399_v37, %v1398_v33  ;;  %v1463_v39 = vpop.f32.mrf.mxu1 }
 0x177   : > { %v904_v40 = vadd.f32 %v872_v36, %v438_v34  ;;  %v1464_v41 = vadd.f32 %v1463_v39, %v1462_v35  ;;  %v1401_v42 = vpop.f32.mrf.mxu0 }
 0x178   : > { %v1465_v44 = vpop.f32.mrf.mxu1 }
 0x179   : > { %920 = vst [vmem:[#allocation2 + $0x10] sm:$0xff] %v904_v40  ;;  %v875_v45 = vadd.f32 %v1464_v41, %v1400_v38  ;;  %v1402_v46 = vpop.f32.mrf.mxu0 }
 0x17a   : > { %v1403_v47 = vadd.f32 %v1402_v46, %v1401_v42  ;;  %v1466_v48 = vpop.f32.mrf.mxu1 }
 0x17b   : > { %v905_v49 = vadd.f32 %v875_v45, %v439_v43  ;;  %v1467_v50 = vadd.f32 %v1466_v48, %v1465_v44  ;;  %v1404_v51 = vpop.f32.mrf.mxu0 }
 0x17c   : > { %v1468_v53 = vpop.f32.mrf.mxu1 }
 0x17d   : > { %921 = vst [vmem:[#allocation2 + $0x38] sm:$0xff] %v905_v49  ;;  %v880_v54 = vadd.f32 %v1467_v50, %v1403_v47  ;;  %v1405_v55 = vpop.f32.mrf.mxu0 }
 0x17e   : > { %v1406_v56 = vadd.f32 %v1405_v55, %v1404_v51  ;;  %v1469_v57 = vpop.f32.mrf.mxu1 }
 0x17f   : > { %v906_v58 = vadd.f32 %v880_v54, %v440_v52  ;;  %v1470_v59 = vadd.f32 %v1469_v57, %v1468_v53  ;;  %v1407_v60 = vpop.f32.mrf.mxu0 }
 0x180   : > { %v1471_v62 = vpop.f32.mrf.mxu1 }
 0x181   : > { %922 = vst [vmem:[#allocation2 + $0x60] sm:$0xff] %v906_v58  ;;  %v883_v63 = vadd.f32 %v1470_v59, %v1406_v56  ;;  %v1408_v0 = vpop.f32.mrf.mxu0 }
 0x182   : > { %v1409_v1 = vadd.f32 %v1408_v0, %v1407_v60  ;;  %v1472_v2 = vpop.f32.mrf.mxu1 }
 0x183   : > { %v907_v3 = vadd.f32 %v883_v63, %v441_v61  ;;  %v1473_v4 = vadd.f32 %v1472_v2, %v1471_v62  ;;  %v1410_v5 = vpop.f32.mrf.mxu0 }
 0x184   : > { %v1474_v7 = vpop.f32.mrf.mxu1 }
 0x185   : > { %923 = vst [vmem:[#allocation2 + $0x70] sm:$0xff] %v907_v3  ;;  %v888_v8 = vadd.f32 %v1473_v4, %v1409_v1  ;;  %v1411_v9 = vpop.f32.mrf.mxu0 }
 0x186   : > { %v1412_v10 = vadd.f32 %v1411_v9, %v1410_v5  ;;  %v1475_v11 = vpop.f32.mrf.mxu1 }
 0x187   : > { %v908_v12 = vadd.f32 %v888_v8, %v442_v6  ;;  %v1476_v13 = vadd.f32 %v1475_v11, %v1474_v7 }
 0x189   : > { %924 = vst [vmem:[#allocation2 + $0x78] sm:$0xff] %v908_v12  ;;  %v891_v15 = vadd.f32 %v1476_v13, %v1412_v10  ;;  %929 = sbr.rel (%p1332_p3) target bundleno = 641 (0x281), region = 60 }
 0x18b   : > { %v909_v16 = vadd.f32 %v891_v15, %v443_v14 }
 0x18d   : > { %925 = vst [vmem:[#allocation2 + $0x28] sm:$0xff] %v909_v16 }
 0x18e   : > { %v1659_v17 = vld [vmem:[#allocation8 + $0x38] sm:$0xff]   ;;  %v1660_v18 = vld [vmem:[#allocation8 + $0x30] sm:$0xff]   ;;  %v1661_v19 = vld [vmem:[#allocation8 + $0x28] sm:$0xff]  }
 0x18f   : > { %1493 = vmatprep.subr.bf16.mxu0 %v1659_v17  ;;  %1525 = vmatprep.subr.bf16.mxu1 %v1659_v17  ;;  %v1662_v20 = vld [vmem:[#allocation8 + $0x20] sm:$0xff]   ;;  %v930_v21 = vld [vmem:[#allocation2 + $0x30] sm:$0xff]  ;;  %v1663_v32 = vld [vmem:[#allocation8 + $0x18] sm:$0xff]  }
 0x190   : > { %1494 = vmatpush3.bf16.msra.mxu0 %v1659_v17  ;;  %1533 = vmatpush3.bf16.msra.mxu1 %v1659_v17  ;;  %v931_v22 = vld [vmem:[#allocation2] sm:$0xff]  ;;  %v1664_v37 = vld [vmem:[#allocation8 + $0x10] sm:$0xff]   ;;  %v1665_v38 = vld [vmem:[#allocation8 + $0x8] sm:$0xff]  }
 0x191   : > { %1495 = vmatprep.subr.bf16.mxu0 %v1660_v18  ;;  %1526 = vmatprep.subr.bf16.mxu1 %v1660_v18  ;;  %v2112_v23 = vld [vmem:[%s2165_s2] ss:$0 sm:$0xff]  ;;  %v932_v39 = vld [vmem:[#allocation2 + $0x58] sm:$0xff]  ;;  %v940_v41 = vld [vmem:[#allocation2 + $0x10] sm:$0xff] }
 0x192   : > { %v953_v24 = vadd.f32 %v2112_v23, %v930_v21  ;;  %v954_v25 = vadd.f32 %v2112_v23, %v931_v22  ;;  %v938_v26 = vld [vmem:[#allocation2 + $0x40] sm:$0xff]  ;;  %v933_v40 = vld [vmem:[#allocation2 + $0x18] sm:$0xff]  ;;  %v934_v43 = vld [vmem:[#allocation2 + $0x50] sm:$0xff]  ;;  %v955_v47 = vadd.f32 %v2112_v23, %v932_v39  ;;  %v963_v49 = vadd.f32 %v2112_v23, %v940_v41 }
 0x193   : > { %v939_v27 = vld [vmem:[#allocation2 + $0x20] sm:$0xff]  ;;  %v961_v28 = vadd.f32 %v2112_v23, %v938_v26  ;;  %v941_v42 = vld [vmem:[#allocation2 + $0x38] sm:$0xff]  ;;  %v935_v44 = vld [vmem:[#allocation2 + $0x68] sm:$0xff]  ;;  %v956_v48 = vadd.f32 %v2112_v23, %v933_v40  ;;  %v957_v51 = vadd.f32 %v2112_v23, %v934_v43 }
 0x194   : > { %1496 = vmatpush3.bf16.msra.mxu0 %v1660_v18  ;;  %1534 = vmatpush3.bf16.msra.mxu1 %v1660_v18  ;;  %v962_v29 = vadd.f32 %v2112_v23, %v939_v27  ;;  %v969_v30 = vmax.f32 %v953_v24, 0.0  ;;  %v970_v31 = vmax.f32 %v954_v25, 0.0  ;;  %v942_v45 = vld [vmem:[#allocation2 + $0x60] sm:$0xff]  ;;  %v943_v46 = vld [vmem:[#allocation2 + $0x70] sm:$0xff]  ;;  %v964_v50 = vadd.f32 %v2112_v23, %v941_v42  ;;  %v936_v60 = vld [vmem:[#allocation2 + $0x8] sm:$0xff] }
 0x195   : > { %1497 = vmatprep.subr.bf16.mxu0 %v1661_v19  ;;  %1527 = vmatprep.subr.bf16.mxu1 %v1661_v19  ;;  %v977_v33 = vmax.f32 %v961_v28, 0.0  ;;  %v958_v52 = vadd.f32 %v2112_v23, %v935_v44  ;;  %v965_v53 = vadd.f32 %v2112_v23, %v942_v45  ;;  %v966_v54 = vadd.f32 %v2112_v23, %v943_v46  ;;  %v1666_v55 = vld [vmem:[#allocation8] sm:$0xff]   ;;  %v937_v61 = vld [vmem:[#allocation2 + $0x48] sm:$0xff]  ;;  %v944_v2 = vld [vmem:[#allocation2 + $0x78] sm:$0xff] }
 0x196   : > { %v978_v34 = vmax.f32 %v962_v29, 0.0  ;;  %v985_v35 = vpack.c.bf16 %v970_v31, %v969_v30  ;;  %v971_v56 = vmax.f32 %v955_v47, 0.0  ;;  %v972_v57 = vmax.f32 %v956_v48, 0.0  ;;  %v945_v3 = vld [vmem:[#allocation2 + $0x28] sm:$0xff]  ;;  %v1334_v18 = vld [vmem:[%s2167_s4] ss:$0 sm:$0xff] }
 0x197   : > { %v979_v58 = vmax.f32 %v963_v49, 0.0  ;;  %v980_v59 = vmax.f32 %v964_v50, 0.0  ;;  %v973_v62 = vmax.f32 %v957_v51, 0.0  ;;  %v974_v63 = vmax.f32 %v958_v52, 0.0 }
 0x198   : > { %1498 = vmatpush3.bf16.msra.mxu0 %v1661_v19  ;;  %1535 = vmatpush3.bf16.msra.mxu1 %v1661_v19  ;;  %v989_v36 = vpack.c.bf16 %v978_v34, %v977_v33  ;;  %v981_v0 = vmax.f32 %v965_v53, 0.0  ;;  %v982_v1 = vmax.f32 %v966_v54, 0.0  ;;  %v986_v4 = vpack.c.bf16 %v972_v57, %v971_v56 }
 0x199   : > { %1499 = vmatprep.subr.bf16.mxu0 %v1662_v20  ;;  %1528 = vmatprep.subr.bf16.mxu1 %v1662_v20  ;;  %v959_v5 = vadd.f32 %v2112_v23, %v936_v60  ;;  %v990_v6 = vpack.c.bf16 %v980_v59, %v979_v58  ;;  %v960_v7 = vadd.f32 %v2112_v23, %v937_v61 }
 0x19a   : > { %1509 = vmatprep.mubr.bf16.mxu0 %v985_v35  ;;  %1517 = vmatprep.mubr.bf16.mxu1 %v989_v36  ;;  %v967_v8 = vadd.f32 %v2112_v23, %v944_v2  ;;  %v968_v9 = vadd.f32 %v2112_v23, %v945_v3  ;;  %v987_v10 = vpack.c.bf16 %v974_v63, %v973_v62 }
 0x19b   : > { %v991_v11 = vpack.c.bf16 %v982_v1, %v981_v0  ;;  %v975_v12 = vmax.f32 %v959_v5, 0.0  ;;  %v976_v13 = vmax.f32 %v960_v7, 0.0 }
 0x19c   : > { %1500 = vmatpush3.bf16.msra.mxu0 %v1662_v20  ;;  %1536 = vmatpush3.bf16.msra.mxu1 %v1662_v20  ;;  %v983_v14 = vmax.f32 %v967_v8, 0.0  ;;  %v984_v15 = vmax.f32 %v968_v9, 0.0 }
 0x19d   : > { %1501 = vmatprep.subr.bf16.mxu0 %v1663_v32  ;;  %1529 = vmatprep.subr.bf16.mxu1 %v1663_v32  ;;  %v988_v16 = vpack.c.bf16 %v976_v13, %v975_v12 }
 0x19e   : > { %v992_v17 = vpack.c.bf16 %v984_v15, %v983_v14 }
 0x1a0   : > { %1502 = vmatpush3.bf16.msra.mxu0 %v1663_v32  ;;  %1537 = vmatpush3.bf16.msra.mxu1 %v1663_v32 }
 0x1a1   : > { %1503 = vmatprep.subr.bf16.mxu0 %v1664_v37  ;;  %1530 = vmatprep.subr.bf16.mxu1 %v1664_v37 }
 0x1a4   : > { %1504 = vmatpush3.bf16.msra.mxu0 %v1664_v37  ;;  %1538 = vmatpush3.bf16.msra.mxu1 %v1664_v37 }
 0x1a5   : > { %1505 = vmatprep.subr.bf16.mxu0 %v1665_v38  ;;  %1531 = vmatprep.subr.bf16.mxu1 %v1665_v38 }
 0x1a8   : > { %1506 = vmatpush3.bf16.msra.mxu0 %v1665_v38  ;;  %1539 = vmatpush3.bf16.msra.mxu1 %v1665_v38 }
 0x1a9   : > { %1507 = vmatprep.subr.bf16.mxu0 %v1666_v55  ;;  %1532 = vmatprep.subr.bf16.mxu1 %v1666_v55 }
 0x1ac   : > { %1508 = vmatpush3.bf16.msra.mxu0 %v1666_v55  ;;  %1540 = vmatpush3.bf16.msra.mxu1 %v1666_v55 }
 0x1af   : > { %1510 = vmatmul.mubr.bf16.vlgmr.msra.gmra.mxu0 %v986_v4  ;;  %1518 = vmatmul.mubr.bf16.vlgmr.msra.gmra.mxu1 %v990_v6 }
 0x1b0   : > { %1513 = vmatprep.mubr.bf16.mxu0 %v987_v10  ;;  %1521 = vmatprep.mubr.bf16.mxu1 %v991_v11 }
 0x1b7   : > { %1514 = vmatmul.mubr.bf16.gmra.mxu0 %v988_v16  ;;  %1522 = vmatmul.mubr.bf16.gmra.mxu1 %v992_v17 }
 0x26f   : > { %v1511_v19 = vpop.f32.mrf.mxu0  ;;  %v1519_v20 = vpop.f32.mrf.mxu1 }
 0x270   : > { %v1107_v21 = vadd.f32 %v1511_v19, %v1334_v18  ;;  %v1139_v22 = vadd.f32 %v1519_v20, %v1334_v18 }
 0x271   : > { %v1098_v23 = vpop.f32.mrf.mxu0  ;;  %v1130_v24 = vpop.f32.mrf.mxu1 }
 0x272   : > { %1163 = vst [vmem:[#allocation9 + $0x10] sm:$0xff] %v1107_v21  ;;  %1171 = vst [vmem:[#allocation9 + $0x50] sm:$0xff] %v1139_v22  ;;  %v1099_v25 = vadd.f32 %v1334_v18, %v1098_v23  ;;  %v1131_v26 = vadd.f32 %v1334_v18, %v1130_v24 }
 0x273   : > { %v1512_v27 = vpop.f32.mrf.mxu0  ;;  %v1520_v28 = vpop.f32.mrf.mxu1 }
 0x274   : > { %1161 = vst [vmem:[#allocation9] sm:$0xff] %v1099_v25  ;;  %1169 = vst [vmem:[#allocation9 + $0x40] sm:$0xff] %v1131_v26  ;;  %v1110_v29 = vadd.f32 %v1512_v27, %v1334_v18  ;;  %v1142_v30 = vadd.f32 %v1520_v28, %v1334_v18 }
 0x275   : > { %v1101_v31 = vpop.f32.mrf.mxu0  ;;  %v1133_v32 = vpop.f32.mrf.mxu1 }
 0x276   : > { %1164 = vst [vmem:[#allocation9 + $0x18] sm:$0xff] %v1110_v29  ;;  %1172 = vst [vmem:[#allocation9 + $0x58] sm:$0xff] %v1142_v30  ;;  %v1102_v33 = vadd.f32 %v1334_v18, %v1101_v31  ;;  %v1134_v34 = vadd.f32 %v1334_v18, %v1133_v32 }
 0x277   : > { %v1515_v35 = vpop.f32.mrf.mxu0  ;;  %v1523_v36 = vpop.f32.mrf.mxu1 }
 0x278   : > { %1162 = vst [vmem:[#allocation9 + $0x8] sm:$0xff] %v1102_v33  ;;  %1170 = vst [vmem:[#allocation9 + $0x48] sm:$0xff] %v1134_v34  ;;  %v1123_v37 = vadd.f32 %v1515_v35, %v1334_v18  ;;  %v1155_v38 = vadd.f32 %v1523_v36, %v1334_v18 }
 0x279   : > { %v1114_v39 = vpop.f32.mrf.mxu0  ;;  %v1146_v40 = vpop.f32.mrf.mxu1 }
 0x27a   : > { %1167 = vst [vmem:[#allocation9 + $0x30] sm:$0xff] %v1123_v37  ;;  %1175 = vst [vmem:[#allocation9 + $0x70] sm:$0xff] %v1155_v38  ;;  %v1115_v41 = vadd.f32 %v1334_v18, %v1114_v39  ;;  %v1147_v42 = vadd.f32 %v1334_v18, %v1146_v40 }
 0x27b   : > { %v1516_v43 = vpop.f32.mrf.mxu0  ;;  %v1524_v44 = vpop.f32.mrf.mxu1 }
 0x27c   : > { %1165 = vst [vmem:[#allocation9 + $0x20] sm:$0xff] %v1115_v41  ;;  %1173 = vst [vmem:[#allocation9 + $0x60] sm:$0xff] %v1147_v42  ;;  %v1126_v45 = vadd.f32 %v1516_v43, %v1334_v18  ;;  %v1158_v46 = vadd.f32 %v1524_v44, %v1334_v18 }
 0x27d   : > { %v1117_v47 = vpop.f32.mrf.mxu0  ;;  %v1149_v48 = vpop.f32.mrf.mxu1 }
 0x27e   : > { %1168 = vst [vmem:[#allocation9 + $0x38] sm:$0xff] %v1126_v45  ;;  %1176 = vst [vmem:[#allocation9 + $0x78] sm:$0xff] %v1158_v46  ;;  %v1118_v49 = vadd.f32 %v1334_v18, %v1117_v47  ;;  %v1150_v50 = vadd.f32 %v1334_v18, %v1149_v48 }
 0x280   : > { %1166 = vst [vmem:[#allocation9 + $0x28] sm:$0xff] %v1118_v49  ;;  %1174 = vst [vmem:[#allocation9 + $0x68] sm:$0xff] %v1150_v50 }
 0x281 PF: > { %p1567_p0 = scmp.eq.s32.totalorder %s1908_s24, 1  ;;  %s1846_s15 = smov [#allocation9]  }
 0x282   : > { %s1186_s17 = sshll.u32 %s1846_s15, 4  ;;  %s1187_s17 = int_to_ptr.vmem [resolvable:$true] %s1186_s17 }
 0x283   : > { %s1749_s18 = scalar_lea.vmem %s1187_s17, 2048  ;;  %p1756_p7 = scmp.lt.s32.totalorder %s1187_s17, %s1187_s17 }
 0x284   : > { %p1750_p1 = scmp.ne.s32.totalorder %s1187_s17, %s1749_s18  ;;  %p1757_p4 = scmp.lt.s32.totalorder %s1749_s18, %s1749_s18 }
 0x286   : > { %p1751_p2 = pnand %p1750_p1, %p1567_p0  ;;  %p1758_p6 = por %p1757_p4, %p1756_p7 }
 0x288   : > { %p1752_p5 = pneg %p1751_p2 }
 0x28a   : > { %p1759_p9 = pnand %p1758_p6, %p1752_p5 }
 0x28c   : > { %1762 = shalt.err (!%p1759_p9)
}
 0x28d   : > { %s1847_s30 = smov 128   ;;  %s1848_s16 = smov 8  }
 0x28e   : > { %1550 = dma.vmem_to_hbm [thread:$0]  (%p1567_p0), %s1187_s17, 2048, %s2168_s5, [#allocation5], %s1847_s30, %s1847_s30, %s1848_s16  }
 0x28f   : > { %1810 = dma.done.wait (%p1567_p0), [#allocation5], 2048  }
 0x290   : > { %1812 = vsyncadd (%p1567_p0), [#allocation5], 4294965248 }
 0x291 PF: > { %s22_s23 = sadd.s32 1, %s1835_s23   ;;  %s2190_s14 = sld [smem:[#allocation14_spill]] }
 0x292   : > { %p19_p10 = scmp.ge.s32.totalorder %s22_s23, 4   ;;  %s2191_s20 = sld [smem:[#allocation16_spill]] }
 0x293   : > { %s2192_s28 = sld [smem:[#allocation15_spill]]  ;;  %s2193_s18 = smov %s1819_s19 }
 0x294   : > { %s2195_s21 = smov %s1831_s22 }
 0x295   :  { %21 = sbr.rel (!%p19_p10) target bundleno = 10 (0xa), region = 103 }
 0x297   : > { %s2194_s19 = smov %s2190_s14 }
 0x299   : > { %s2196_s22 = smov %s2192_s28 }
 0x29a   :  { %1202 = vsyncpa [#allocation4], 1 }
 0x29b   :  { %1204 = vsyncpa [#allocation4 + $0x1], 1 }
 0x29c   :  { %1205 = vsyncpa [#allocation7], 1 }
 0x29d   :  { %1207 = vsyncpa [#allocation7 + $0x1], 1 }
 0x29e   :  { %1208 = vsyncpa [#allocation5], 1 }
 0x29f   :  { %1210 = vsyncpa [#allocation5 + $0x1], 1 }

</bundles_post_ra>
